<compile_context>
chip_gen: v6e
topology: v6e:2x2x1
jax: 0.10.0
libtpu: 0.0.40
codegen_flags: <defaults>
</compile_context>

<pallas_src>
import jax
import jax.numpy as jnp
import numpy as np
from jax.experimental import pallas as pl
from jax.experimental.pallas import tpu as pltpu

INPUT_DIM = 7                 # sensor channels
SEQ_LEN = 5                   # time steps
HIDDEN = 128                  # LSTM hidden size per direction
C1 = 64                       # conv1 out channels
C2 = 128                      # conv2 out channels
K1 = 32                       # conv1 im2col width: 21 taps + bias + 2 mask lanes, pad to 32
SEG = 8                       # rows per batch segment [pad, x0..x4, pad, spare]
NSEG = 8                      # pooled segments -> full (8,128) output tile
MP = (NSEG + 1) * SEG         # 72 conv1 rows (extra zero segment feeds last conv2 windows)
M2 = NSEG * SEG               # 64 conv2 output rows
LANE_BIAS = 3 * INPUT_DIM     # 21: ones column (conv1 bias folded into the matmul)
LANE_MD = LANE_BIAS + 1       # 22: {0,1} data-row mask lane
LANE_MP = LANE_BIAS + 2       # 23: {0,NEG} pooling mask lane
NEG = -1e9                    # finite "minus infinity" (safe through the conv1 matmul)
BN_EPS = 1e-5


def _sigmoid(z):
    return 1.0 / (1.0 + jnp.exp(-z))


def fall_kernel(xcol_ref, wcat_ref, gcat_ref, out_ref):
    H = HIDDEN

    # ---- Conv1d(7 -> 64, k=3, pad=1): one batched im2col matmul, bias folded ----
    z1 = jnp.dot(xcol_ref[...], wcat_ref[0:K1, :],
                 preferred_element_type=jnp.float32)                 # (72, 128)
    s1 = gcat_ref[0:1, 0:C2]
    t1 = gcat_ref[1:2, 0:C2]
    # ReLU then BN (module order), then zero non-data rows with the precomputed mask
    h1 = (jnp.maximum(z1, 0.0) * s1 + t1) * xcol_ref[:, LANE_MD:LANE_MD + 1]

    # ---- Conv1d(64 -> 128, k=3, pad=1): three accumulated full-lane tap dots ----
    w2a = wcat_ref[K1:K1 + C2, :]
    w2b = wcat_ref[K1 + C2:K1 + 2 * C2, :]
    w2c = wcat_ref[K1 + 2 * C2:K1 + 3 * C2, :]
    z2 = (jnp.dot(h1[0:M2, :], w2a, preferred_element_type=jnp.float32)
          + jnp.dot(h1[1:M2 + 1, :], w2b, preferred_element_type=jnp.float32)
          + jnp.dot(h1[2:M2 + 2, :], w2c, preferred_element_type=jnp.float32))
    b2 = gcat_ref[2:3, 0:C2]
    s2 = gcat_ref[3:4, 0:C2]
    t2 = gcat_ref[4:5, 0:C2]
    h2 = jnp.maximum(z2 + b2, 0.0) * s2 + t2                          # (64, 128)

    # ---- AdaptiveMaxPool1d(1): additive mask + tile-aligned segment max ----
    h2m = h2 + xcol_ref[0:M2, LANE_MP:LANE_MP + 1]
    feat = jnp.max(h2m.reshape(NSEG, SEG, C2), axis=1)                # (8, 128)

    # ---- single-step BiLSTM (h0 = c0 = 0): fused directions, forget gate dropped ----
    bg = gcat_ref[5:6, :]
    gates = jnp.dot(feat, gcat_ref[8:8 + C2, :],
                    preferred_element_type=jnp.float32) + bg          # (8, 768)

    def sig(z):                                    # EUP tanh instead of VALU divide
        return 0.5 * (jnp.tanh(0.5 * z) + 1.0)

    def half(off):                                 # torch gate order i,(f),g,o
        i = sig(gates[:, off:off + H])
        g = jnp.tanh(gates[:, off + H:off + 2 * H])
        o = sig(gates[:, off + 2 * H:off + 3 * H])
        return o * jnp.tanh(i * g)                 # c1 = i*g since c0 = 0

    h_f = half(0)
    h_b = half(3 * H)

    # ---- fc: Dropout (eval identity) + Linear(256 -> 1) as lane reductions ----
    wfc_f = gcat_ref[6:7, 0:H]
    wfc_b = gcat_ref[6:7, H:2 * H]
    bfc = gcat_ref[7:8, 0:C2]                                         # bias replicated/lane
    logit = (jnp.sum(h_f * wfc_f, axis=-1, keepdims=True)
             + jnp.sum(h_b * wfc_b, axis=-1, keepdims=True))          # (8, 1)
    out_ref[...] = logit + bfc                                        # lane-dense (8, 128)


def pack_weights(params):
    """Runs ONCE per parameter set; everything here is cached off the call path."""
    (w1, b1, s1, t1, w2, b2, s2, t2, wih_f, bg_f, wih_b, bg_b, wfc, bfc) = params
    H = HIDDEN

    # conv1 weight as (K1, 128): per-tap (Cin,64) blocks + bias row; mask lanes stay zero
    w1col = jnp.zeros((K1, C2), jnp.float32)
    for k in range(3):
        w1col = w1col.at[k * INPUT_DIM:(k + 1) * INPUT_DIM, 0:C1].set(w1[:, :, k].T)
    w1col = w1col.at[LANE_BIAS, 0:C1].set(b1)

    # conv2 weight as three (128,128) tap blocks (rows >= C1 are zero)
    taps = []
    for k in range(3):
        taps.append(jnp.zeros((C2, C2), jnp.float32).at[0:C1, :].set(w2[:, :, k].T))
    wcat = jnp.concatenate([w1col] + taps, axis=0)                    # (416, 128)

    # fused BiLSTM input weights/bias, forget gate removed (torch gate order i,f,g,o)
    def igo(w):                                   # (4H, 128) -> (128, 3H)
        return jnp.concatenate([w[0:H], w[2 * H:3 * H], w[3 * H:4 * H]], axis=0).T

    def igo_b(b):                                 # (4H,) -> (3H,)
        return jnp.concatenate([b[0:H], b[2 * H:3 * H], b[3 * H:4 * H]])

    wih = jnp.concatenate([igo(wih_f), igo(wih_b)], axis=1)           # (128, 768)
    bg = jnp.concatenate([igo_b(bg_f), igo_b(bg_b)])                  # (768,)

    # one packed slab for every small vector, stacked on top of wih -> single DMA
    slab = jnp.zeros((8, 6 * H), jnp.float32)
    slab = slab.at[0, 0:C1].set(s1)
    slab = slab.at[1, 0:C1].set(t1)
    slab = slab.at[2, 0:C2].set(b2)
    slab = slab.at[3, 0:C2].set(s2)
    slab = slab.at[4, 0:C2].set(t2)
    slab = slab.at[5, :].set(bg)
    slab = slab.at[6, 0:2 * H].set(wfc[0])
    slab = slab.at[7, 0:C2].set(jnp.full((C2,), bfc[0], jnp.float32))
    gcat = jnp.concatenate([slab, wih], axis=0)                       # (136, 768)

    return jax.device_put(wcat), jax.device_put(gcat)


def _row_masks(B):
    idx = np.arange(MP)
    pos = idx % SEG
    bat = idx // SEG
    data = ((pos >= 1) & (pos <= SEQ_LEN) & (bat < B)).astype(np.float32)
    pool = np.where((pos < SEQ_LEN) & (bat < B), 0.0, NEG).astype(np.float32)
    return jnp.asarray(data), jnp.asarray(pool)


def pack_x(x):
    """Per-call path: im2col of x into whole-sublane-tile segments + mask lanes."""
    B, L, Cin = x.shape
    xpad = jnp.pad(x.astype(jnp.float32), ((0, 0), (1, 1), (0, 0)))   # (B, L+2, Cin)
    wins = jnp.concatenate([xpad[:, k:k + L, :] for k in range(3)], axis=-1)
    wins = jnp.concatenate([wins, jnp.ones((B, L, 1), jnp.float32)], axis=-1)
    xcol = jnp.zeros((MP // SEG, SEG, K1), jnp.float32)
    xcol = xcol.at[:B, 1:L + 1, :3 * Cin + 1].set(wins)
    xcol = xcol.reshape(MP, K1)
    mdata, mpool = _row_masks(B)                    # compile-time constants under jit
    xcol = xcol.at[:, LANE_MD].set(mdata)
    xcol = xcol.at[:, LANE_MP].set(mpool)
    return xcol                                     # (72, 32)


def _full_spec(shape):
    zeros = (0,) * len(shape)
    return pl.BlockSpec(shape, lambda i, _z=zeros: _z)


@jax.jit
def fall_forward(x, wcat, gcat):
    B, L, Cin = x.shape
    assert L == SEQ_LEN and Cin == INPUT_DIM and B <= NSEG
    xcol = pack_x(x)
    out = pl.pallas_call(
        fall_kernel,
        out_shape=jax.ShapeDtypeStruct((NSEG, C2), jnp.float32),
        grid_spec=pltpu.PrefetchScalarGridSpec(
            num_scalar_prefetch=0,
            grid=(1,),
            in_specs=[_full_spec((MP, K1)),
                      _full_spec((K1 + 3 * C2, C2)),
                      _full_spec((8 + C2, 6 * HIDDEN))],
            out_specs=pl.BlockSpec((NSEG, C2), lambda i: (0, 0)),
        ),
        compiler_params=pltpu.CompilerParams(
            dimension_semantics=("arbitrary",)),
    )(xcol, wcat, gcat)
    return out[:B, 0]                               # logit column == out.squeeze(1)


def init_params(key):
    ks = jax.random.split(key, 20)

    def nrm(k, shape, scale=0.1):
        return scale * jax.random.normal(k, shape, dtype=jnp.float32)

    # Conv1 + BatchNorm1d(64) (eval mode folded to scale/shift)
    w1 = nrm(ks[0], (C1, INPUT_DIM, 3))
    b1 = nrm(ks[1], (C1,))
    g1 = 1.0 + 0.1 * jax.random.normal(ks[2], (C1,), dtype=jnp.float32)
    be1 = nrm(ks[3], (C1,))
    m1 = nrm(ks[4], (C1,))
    v1 = 0.5 + jax.random.uniform(ks[5], (C1,), dtype=jnp.float32)
    s1 = g1 / jnp.sqrt(v1 + BN_EPS)
    t1 = be1 - m1 * s1

    # Conv2 + BatchNorm1d(128)
    w2 = nrm(ks[6], (C2, C1, 3))
    b2 = nrm(ks[7], (C2,))
    g2 = 1.0 + 0.1 * jax.random.normal(ks[8], (C2,), dtype=jnp.float32)
    be2 = nrm(ks[9], (C2,))
    m2 = nrm(ks[10], (C2,))
    v2 = 0.5 + jax.random.uniform(ks[11], (C2,), dtype=jnp.float32)
    s2 = g2 / jnp.sqrt(v2 + BN_EPS)
    t2 = be2 - m2 * s2

    # BiLSTM: weight_ih per direction (4H, 128); weight_hh unused since h0 = 0, seq len 1
    wih_f = nrm(ks[12], (4 * HIDDEN, C2))
    bg_f = nrm(ks[13], (4 * HIDDEN,)) + nrm(ks[14], (4 * HIDDEN,))    # b_ih + b_hh
    wih_b = nrm(ks[15], (4 * HIDDEN, C2))
    bg_b = nrm(ks[16], (4 * HIDDEN,)) + nrm(ks[17], (4 * HIDDEN,))

    # fc: Linear(256 -> 1)
    wfc = nrm(ks[18], (1, 2 * HIDDEN))
    bfc = nrm(ks[19], (1,))

    return (w1, b1, s1, t1, w2, b2, s2, t2, wih_f, bg_f, wih_b, bg_b, wfc, bfc)


def reference(x, params):
    """Pure-JAX re-implementation of the PyTorch forward (eval mode)."""
    (w1, b1, s1, t1, w2, b2, s2, t2, wih_f, bg_f, wih_b, bg_b, wfc, bfc) = params
    B, L, _ = x.shape
    H = HIDDEN

    xp = jnp.pad(x.astype(jnp.float32), ((0, 0), (1, 1), (0, 0)))
    h1 = sum(jnp.einsum('bli,oi->blo', xp[:, k:k + L, :], w1[:, :, k])
             for k in range(3)) + b1
    h1 = jnp.maximum(h1, 0.0) * s1 + t1                 # Conv -> ReLU -> BN

    h1p = jnp.pad(h1, ((0, 0), (1, 1), (0, 0)))
    h2 = sum(jnp.einsum('bli,oi->blo', h1p[:, k:k + L, :], w2[:, :, k])
             for k in range(3)) + b2
    h2 = jnp.maximum(h2, 0.0) * s2 + t2

    feat = jnp.max(h2, axis=1)                          # AdaptiveMaxPool1d(1)

    def direction(wih, bg):                             # full gate math, single step
        gates = feat @ wih.T + bg
        i = _sigmoid(gates[:, 0:H])
        f = _sigmoid(gates[:, H:2 * H])
        g = jnp.tanh(gates[:, 2 * H:3 * H])
        o = _sigmoid(gates[:, 3 * H:4 * H])
        c = f * 0.0 + i * g                             # c0 = 0
        return o * jnp.tanh(c)

    h_f = direction(wih_f, bg_f)
    h_b = direction(wih_b, bg_b)
    hcat = jnp.concatenate([h_f, h_b], axis=1)
    out = hcat @ wfc.T + bfc
    return out[:, 0]


if __name__ == "__main__":
    key = jax.random.PRNGKey(0)
    kx, kp = jax.random.split(key)
    B = 2
    x = jax.random.normal(kx, (B, SEQ_LEN, INPUT_DIM), dtype=jnp.float32)
    params = init_params(kp)

    wcat, gcat = pack_weights(params)      # one-time packing, cached off the call path
    out = jax.block_until_ready(fall_forward(x, wcat, gcat))
    ref = reference(x, params)

    assert out.shape == (B,), out.shape
    err = float(jnp.max(jnp.abs(out - ref)))
    if err < 1e-3:
        print("KERNEL_OK")
    else:
        raise SystemExit(f"kernel/reference mismatch, max abs err = {err}")
</pallas_src>

<mosaic_0001>
module attributes {stable_mosaic.version = 11 : i64} {
  func.func @fall_kernel(%arg0: i32, %arg1: memref<72x32xf32, #tpu.memory_space<vmem>>, %arg2: memref<416x128xf32, #tpu.memory_space<vmem>>, %arg3: memref<136x768xf32, #tpu.memory_space<vmem>>, %arg4: memref<8x128xf32, #tpu.memory_space<vmem>>) attributes {dimension_semantics = [#tpu.dimension_semantics<arbitrary>], iteration_bounds = array<i64: 1>, scalar_prefetch = 0 : i64, scratch_operands = 0 : i64, tpu.core_type = #tpu.core_type<tc>, window_params = [{pipeline_mode = #tpu.pipeline_mode<synchronous>, transform_indices = @transform_0, window_bounds = array<i64: 72, 32>}, {pipeline_mode = #tpu.pipeline_mode<synchronous>, transform_indices = @transform_1, window_bounds = array<i64: 416, 128>}, {pipeline_mode = #tpu.pipeline_mode<synchronous>, transform_indices = @transform_2, window_bounds = array<i64: 136, 768>}, {pipeline_mode = #tpu.pipeline_mode<synchronous>, transform_indices = @transform_3, window_bounds = array<i64: 8, 128>}]} {
    %c0 = arith.constant 0 : index
    %c0_0 = arith.constant 0 : index
    %0 = vector.load %arg1[%c0, %c0_0] : memref<72x32xf32, #tpu.memory_space<vmem>>, vector<72x32xf32>
    %c0_1 = arith.constant 0 : index
    %c0_2 = arith.constant 0 : index
    %1 = vector.load %arg2[%c0_1, %c0_2] : memref<416x128xf32, #tpu.memory_space<vmem>>, vector<32x128xf32>
    %cst = arith.constant dense<0.000000e+00> : vector<72x128xf32>
    %2 = tpu.matmul %0, %1, %cst {dimension_numbers = #tpu.dot_dimension_numbers<[1], [0], [0], [1], [0, 0, 1, 1], [], []>} : vector<72x32xf32>, vector<32x128xf32>, vector<72x128xf32> -> vector<72x128xf32>
    %c0_3 = arith.constant 0 : index
    %c0_4 = arith.constant 0 : index
    %3 = vector.load %arg3[%c0_3, %c0_4] : memref<136x768xf32, #tpu.memory_space<vmem>>, vector<1x128xf32>
    %c1 = arith.constant 1 : index
    %c0_5 = arith.constant 0 : index
    %4 = vector.load %arg3[%c1, %c0_5] : memref<136x768xf32, #tpu.memory_space<vmem>>, vector<1x128xf32>
    %cst_6 = arith.constant 0.000000e+00 : f32
    %5 = vector.broadcast %cst_6 : f32 to vector<72x128xf32>
    %6 = arith.maximumf %2, %5 : vector<72x128xf32>
    %7 = vector.broadcast %3 : vector<1x128xf32> to vector<72x128xf32>
    %8 = arith.mulf %6, %7 : vector<72x128xf32>
    %9 = vector.broadcast %4 : vector<1x128xf32> to vector<72x128xf32>
    %10 = arith.addf %8, %9 : vector<72x128xf32>
    %c0_7 = arith.constant 0 : index
    %c22 = arith.constant 22 : index
    %11 = vector.load %arg1[%c0_7, %c22] : memref<72x32xf32, #tpu.memory_space<vmem>>, vector<72x1xf32>
    %12 = vector.broadcast %11 : vector<72x1xf32> to vector<72x128xf32>
    %13 = arith.mulf %10, %12 : vector<72x128xf32>
    %c32 = arith.constant 32 : index
    %c0_8 = arith.constant 0 : index
    %14 = vector.load %arg2[%c32, %c0_8] : memref<416x128xf32, #tpu.memory_space<vmem>>, vector<128x128xf32>
    %c160 = arith.constant 160 : index
    %c0_9 = arith.constant 0 : index
    %15 = vector.load %arg2[%c160, %c0_9] : memref<416x128xf32, #tpu.memory_space<vmem>>, vector<128x128xf32>
    %c288 = arith.constant 288 : index
    %c0_10 = arith.constant 0 : index
    %16 = vector.load %arg2[%c288, %c0_10] : memref<416x128xf32, #tpu.memory_space<vmem>>, vector<128x128xf32>
    %17 = vector.extract_strided_slice %13 {offsets = [0, 0], sizes = [64, 128], strides = [1, 1]} : vector<72x128xf32> to vector<64x128xf32>
    %cst_11 = arith.constant dense<0.000000e+00> : vector<64x128xf32>
    %18 = tpu.matmul %17, %14, %cst_11 {dimension_numbers = #tpu.dot_dimension_numbers<[1], [0], [0], [1], [0, 0, 1, 1], [], []>} : vector<64x128xf32>, vector<128x128xf32>, vector<64x128xf32> -> vector<64x128xf32>
    %19 = vector.extract_strided_slice %13 {offsets = [1, 0], sizes = [64, 128], strides = [1, 1]} : vector<72x128xf32> to vector<64x128xf32>
    %cst_12 = arith.constant dense<0.000000e+00> : vector<64x128xf32>
    %20 = tpu.matmul %19, %15, %cst_12 {dimension_numbers = #tpu.dot_dimension_numbers<[1], [0], [0], [1], [0, 0, 1, 1], [], []>} : vector<64x128xf32>, vector<128x128xf32>, vector<64x128xf32> -> vector<64x128xf32>
    %21 = arith.addf %18, %20 : vector<64x128xf32>
    %22 = vector.extract_strided_slice %13 {offsets = [2, 0], sizes = [64, 128], strides = [1, 1]} : vector<72x128xf32> to vector<64x128xf32>
    %cst_13 = arith.constant dense<0.000000e+00> : vector<64x128xf32>
    %23 = tpu.matmul %22, %16, %cst_13 {dimension_numbers = #tpu.dot_dimension_numbers<[1], [0], [0], [1], [0, 0, 1, 1], [], []>} : vector<64x128xf32>, vector<128x128xf32>, vector<64x128xf32> -> vector<64x128xf32>
    %24 = arith.addf %21, %23 : vector<64x128xf32>
    %c2 = arith.constant 2 : index
    %c0_14 = arith.constant 0 : index
    %25 = vector.load %arg3[%c2, %c0_14] : memref<136x768xf32, #tpu.memory_space<vmem>>, vector<1x128xf32>
    %c3 = arith.constant 3 : index
    %c0_15 = arith.constant 0 : index
    %26 = vector.load %arg3[%c3, %c0_15] : memref<136x768xf32, #tpu.memory_space<vmem>>, vector<1x128xf32>
    %c4 = arith.constant 4 : index
    %c0_16 = arith.constant 0 : index
    %27 = vector.load %arg3[%c4, %c0_16] : memref<136x768xf32, #tpu.memory_space<vmem>>, vector<1x128xf32>
    %28 = vector.broadcast %25 : vector<1x128xf32> to vector<64x128xf32>
    %29 = arith.addf %24, %28 : vector<64x128xf32>
    %cst_17 = arith.constant 0.000000e+00 : f32
    %30 = vector.broadcast %cst_17 : f32 to vector<64x128xf32>
    %31 = arith.maximumf %29, %30 : vector<64x128xf32>
    %32 = vector.broadcast %26 : vector<1x128xf32> to vector<64x128xf32>
    %33 = arith.mulf %31, %32 : vector<64x128xf32>
    %34 = vector.broadcast %27 : vector<1x128xf32> to vector<64x128xf32>
    %35 = arith.addf %33, %34 : vector<64x128xf32>
    %c0_18 = arith.constant 0 : index
    %c23 = arith.constant 23 : index
    %36 = vector.load %arg1[%c0_18, %c23] : memref<72x32xf32, #tpu.memory_space<vmem>>, vector<64x1xf32>
    %37 = vector.broadcast %36 : vector<64x1xf32> to vector<64x128xf32>
    %38 = arith.addf %35, %37 : vector<64x128xf32>
    %39 = vector.shape_cast %38 : vector<64x128xf32> to vector<8x8x128xf32>
    %cst_19 = arith.constant dense<0xFF800000> : vector<8x128xf32>
    %40 = vector.multi_reduction <maximumf>, %39, %cst_19 [1] : vector<8x8x128xf32> to vector<8x128xf32>
    %c5 = arith.constant 5 : index
    %c0_20 = arith.constant 0 : index
    %41 = vector.load %arg3[%c5, %c0_20] : memref<136x768xf32, #tpu.memory_space<vmem>>, vector<1x768xf32>
    %c8 = arith.constant 8 : index
    %c0_21 = arith.constant 0 : index
    %42 = vector.load %arg3[%c8, %c0_21] : memref<136x768xf32, #tpu.memory_space<vmem>>, vector<128x768xf32>
    %cst_22 = arith.constant dense<0.000000e+00> : vector<8x768xf32>
    %43 = tpu.matmul %40, %42, %cst_22 {dimension_numbers = #tpu.dot_dimension_numbers<[1], [0], [0], [1], [0, 0, 1, 1], [], []>} : vector<8x128xf32>, vector<128x768xf32>, vector<8x768xf32> -> vector<8x768xf32>
    %44 = vector.broadcast %41 : vector<1x768xf32> to vector<8x768xf32>
    %45 = arith.addf %43, %44 : vector<8x768xf32>
    %46 = vector.extract_strided_slice %45 {offsets = [0, 0], sizes = [8, 128], strides = [1, 1]} : vector<8x768xf32> to vector<8x128xf32>
    %cst_23 = arith.constant 5.000000e-01 : f32
    %47 = vector.broadcast %cst_23 : f32 to vector<8x128xf32>
    %48 = arith.mulf %47, %46 : vector<8x128xf32>
    %49 = math.tanh %48 : vector<8x128xf32>
    %cst_24 = arith.constant 1.000000e+00 : f32
    %50 = vector.broadcast %cst_24 : f32 to vector<8x128xf32>
    %51 = arith.addf %49, %50 : vector<8x128xf32>
    %cst_25 = arith.constant 5.000000e-01 : f32
    %52 = vector.broadcast %cst_25 : f32 to vector<8x128xf32>
    %53 = arith.mulf %52, %51 : vector<8x128xf32>
    %54 = vector.extract_strided_slice %45 {offsets = [0, 128], sizes = [8, 128], strides = [1, 1]} : vector<8x768xf32> to vector<8x128xf32>
    %55 = math.tanh %54 : vector<8x128xf32>
    %56 = vector.extract_strided_slice %45 {offsets = [0, 256], sizes = [8, 128], strides = [1, 1]} : vector<8x768xf32> to vector<8x128xf32>
    %cst_26 = arith.constant 5.000000e-01 : f32
    %57 = vector.broadcast %cst_26 : f32 to vector<8x128xf32>
    %58 = arith.mulf %57, %56 : vector<8x128xf32>
    %59 = math.tanh %58 : vector<8x128xf32>
    %cst_27 = arith.constant 1.000000e+00 : f32
    %60 = vector.broadcast %cst_27 : f32 to vector<8x128xf32>
    %61 = arith.addf %59, %60 : vector<8x128xf32>
    %cst_28 = arith.constant 5.000000e-01 : f32
    %62 = vector.broadcast %cst_28 : f32 to vector<8x128xf32>
    %63 = arith.mulf %62, %61 : vector<8x128xf32>
    %64 = arith.mulf %53, %55 : vector<8x128xf32>
    %65 = math.tanh %64 : vector<8x128xf32>
    %66 = arith.mulf %63, %65 : vector<8x128xf32>
    %67 = vector.extract_strided_slice %45 {offsets = [0, 384], sizes = [8, 128], strides = [1, 1]} : vector<8x768xf32> to vector<8x128xf32>
    %cst_29 = arith.constant 5.000000e-01 : f32
    %68 = vector.broadcast %cst_29 : f32 to vector<8x128xf32>
    %69 = arith.mulf %68, %67 : vector<8x128xf32>
    %70 = math.tanh %69 : vector<8x128xf32>
    %cst_30 = arith.constant 1.000000e+00 : f32
    %71 = vector.broadcast %cst_30 : f32 to vector<8x128xf32>
    %72 = arith.addf %70, %71 : vector<8x128xf32>
    %cst_31 = arith.constant 5.000000e-01 : f32
    %73 = vector.broadcast %cst_31 : f32 to vector<8x128xf32>
    %74 = arith.mulf %73, %72 : vector<8x128xf32>
    %75 = vector.extract_strided_slice %45 {offsets = [0, 512], sizes = [8, 128], strides = [1, 1]} : vector<8x768xf32> to vector<8x128xf32>
    %76 = math.tanh %75 : vector<8x128xf32>
    %77 = vector.extract_strided_slice %45 {offsets = [0, 640], sizes = [8, 128], strides = [1, 1]} : vector<8x768xf32> to vector<8x128xf32>
    %cst_32 = arith.constant 5.000000e-01 : f32
    %78 = vector.broadcast %cst_32 : f32 to vector<8x128xf32>
    %79 = arith.mulf %78, %77 : vector<8x128xf32>
    %80 = math.tanh %79 : vector<8x128xf32>
    %cst_33 = arith.constant 1.000000e+00 : f32
    %81 = vector.broadcast %cst_33 : f32 to vector<8x128xf32>
    %82 = arith.addf %80, %81 : vector<8x128xf32>
    %cst_34 = arith.constant 5.000000e-01 : f32
    %83 = vector.broadcast %cst_34 : f32 to vector<8x128xf32>
    %84 = arith.mulf %83, %82 : vector<8x128xf32>
    %85 = arith.mulf %74, %76 : vector<8x128xf32>
    %86 = math.tanh %85 : vector<8x128xf32>
    %87 = arith.mulf %84, %86 : vector<8x128xf32>
    %c6 = arith.constant 6 : index
    %c0_35 = arith.constant 0 : index
    %88 = vector.load %arg3[%c6, %c0_35] : memref<136x768xf32, #tpu.memory_space<vmem>>, vector<1x128xf32>
    %c6_36 = arith.constant 6 : index
    %c128 = arith.constant 128 : index
    %89 = vector.load %arg3[%c6_36, %c128] : memref<136x768xf32, #tpu.memory_space<vmem>>, vector<1x128xf32>
    %c7 = arith.constant 7 : index
    %c0_37 = arith.constant 0 : index
    %90 = vector.load %arg3[%c7, %c0_37] : memref<136x768xf32, #tpu.memory_space<vmem>>, vector<1x128xf32>
    %91 = vector.broadcast %88 : vector<1x128xf32> to vector<8x128xf32>
    %92 = arith.mulf %66, %91 : vector<8x128xf32>
    %cst_38 = arith.constant dense<0.000000e+00> : vector<8xf32>
    %93 = vector.multi_reduction <add>, %92, %cst_38 [1] : vector<8x128xf32> to vector<8xf32>
    %94 = vector.shape_cast %93 : vector<8xf32> to vector<8x1xf32>
    %95 = vector.broadcast %89 : vector<1x128xf32> to vector<8x128xf32>
    %96 = arith.mulf %87, %95 : vector<8x128xf32>
    %cst_39 = arith.constant dense<0.000000e+00> : vector<8xf32>
    %97 = vector.multi_reduction <add>, %96, %cst_39 [1] : vector<8x128xf32> to vector<8xf32>
    %98 = vector.shape_cast %97 : vector<8xf32> to vector<8x1xf32>
    %99 = arith.addf %94, %98 : vector<8x1xf32>
    %100 = vector.broadcast %99 : vector<8x1xf32> to vector<8x128xf32>
    %101 = vector.broadcast %90 : vector<1x128xf32> to vector<8x128xf32>
    %102 = arith.addf %100, %101 : vector<8x128xf32>
    %c0_40 = arith.constant 0 : index
    %c0_41 = arith.constant 0 : index
    %103 = vector.load %arg4[%c0_40, %c0_41] : memref<8x128xf32, #tpu.memory_space<vmem>>, vector<8x128xf32>
    tpu.vector_store %arg4[%c0_40, %c0_41], %102 {strides = array<i32>} : memref<8x128xf32, #tpu.memory_space<vmem>>, vector<8x128xf32>,
    return
  }
  func.func @transform_0(%arg0: i32) -> (i32, i32) {
    %c0_i32 = arith.constant 0 : i32
    %c0_i32_0 = arith.constant 0 : i32
    %c0_i32_1 = arith.constant 0 : i32
    return %c0_i32, %c0_i32_0 : i32, i32
  }
  func.func @transform_1(%arg0: i32) -> (i32, i32) {
    %c0_i32 = arith.constant 0 : i32
    %c0_i32_0 = arith.constant 0 : i32
    %c0_i32_1 = arith.constant 0 : i32
    return %c0_i32, %c0_i32_0 : i32, i32
  }
  func.func @transform_2(%arg0: i32) -> (i32, i32) {
    %c0_i32 = arith.constant 0 : i32
    %c0_i32_0 = arith.constant 0 : i32
    %c0_i32_1 = arith.constant 0 : i32
    return %c0_i32, %c0_i32_0 : i32, i32
  }
  func.func @transform_3(%arg0: i32) -> (i32, i32) {
    %c0_i32 = arith.constant 0 : i32
    %c0_i32_0 = arith.constant 0 : i32
    %c0_i32_1 = arith.constant 0 : i32
    return %c0_i32, %c0_i32_0 : i32, i32
  }
}

</mosaic_0001>

<bundles_post_ra>
// kernel: fall_forward.1
= control target key start
LH: loop header
LB: loop body
LE: loop exit
PB: predicated region body
PF: predicated region fallthrough
CT: control target
= control target key end

     0   :  { %8 = vsyncpa [#allocation3], 0  ;;  %s1552_s12 = smov [#allocation2]   ;;  %s2127_s0 = inlined_call_operand.vmem [shape: f32[72,32], index: 0, kind: input, shape index: {}]   ;;  %s2128_s1 = inlined_call_operand.hbm [shape: f32[416,128], index: 1, kind: input, shape index: {}]   ;;  %s2129_s2 = inlined_call_operand.vmem [shape: f32[136,768], index: 2, kind: input, shape index: {}]   ;;  %s2130_s3 = inlined_call_operand.vmem [shape: f32[8,128], index: 3, kind: output, shape index: {}]  }
   0x1   :  { %s16_s13 = sshll.u32 %s1552_s12, 4  ;;  %s17_s13 = int_to_ptr.vmem [resolvable:$true] %s16_s13 }
   0x2   :  { %s1538_s14 = scalar_lea.vmem %s17_s13, 6656  ;;  %p1543_p1 = scmp.lt.s32.totalorder %s17_s13, %s17_s13 }
   0x3   :  { %p1539_p0 = scmp.ne.s32.totalorder %s17_s13, %s1538_s14  ;;  %p1544_p2 = scmp.lt.s32.totalorder %s1538_s14, %s1538_s14 }
   0x5   :  { %p1545_p3 = por %p1544_p2, %p1543_p1 }
   0x7   :  { %p1546_p4 = pnand %p1545_p3, %p1539_p0 }
   0x9   :  { %1549 = shalt.err (!%p1546_p4)
}
   0xa   :  { %s1553_s15 = smov 128   ;;  %s1554_s16 = smov 8  }
   0xb   :  { %22 = dma.hbm_to_vmem [thread:$0]  %s2128_s1, 6656, %s17_s13, [#allocation3], %s1553_s15, %s1553_s15, %s1554_s16  }
   0xc   :  { %1550 = dma.done.wait [#allocation3], 6656  }
   0xd   :  { %1551 = vsyncadd [#allocation3], 4294960640  ;;  %v1555_v0 = vmov 0.0   ;;  %vm1556_vm0 = vmmov 0   ;;  %v1557_v1 = vmov 22   ;;  %v40_v2 = vld [vmem:[#allocation2 + $0x18] sm:$0xff] }
   0xe   :  { %1328 = vmatprep.subr.mxu0 %v1555_v0  ;;  %1495 = vmatprep.subr.mxu1 %v1555_v0  ;;  %v39_v3 = vld [vmem:[#allocation2 + $0x10] sm:$0xff]  ;;  %v38_v4 = vld [vmem:[#allocation2 + $0x8] sm:$0xff]  ;;  %v37_v5 = vld [vmem:[#allocation2] sm:$0xff]  ;;  %vm41_vm1 = vcmask 261120   ;;  %v1558_v48 = vmov 23   ;;  %vm310_vm2 = vcmask 1046528  }
   0xf   :  { %1336 = vmatprep.mubr.msk.f32.mxu0 %vm1556_vm0, %v1555_v0  ;;  %1360 = vmatprep.mubr.msk.f32.mxu1 %vm1556_vm0, %v1555_v0  ;;  %v1595_v6 = vld [vmem:[%s2127_s0] sm:$0xff]  ;;  %v268_v8 = vld [vmem:[#allocation2 + $0x98] sm:$0xff]  ;;  %v1610_v10 = vld [vmem:[%s2127_s0 + $0x8] sm:$0xff]  ;;  %vm546_vm3 = vcmask 1045504   ;;  %vm963_vm4 = vcmask 1041409   ;;  %vm965_vm5 = vcmask 1042434  }
  0x10   :  { %1510 = vset.pattern.permute.xlu0 %v1557_v1  ;;  %1511 = vset.pattern.permute.xlu1 %v1557_v1  ;;  %v36_v7 = vld [vmem:[%s2127_s0 + $0x40] sm:$0xff]  ;;  %v284_v9 = vld [vmem:[#allocation2 + $0x118] sm:$0xff]  ;;  %v1615_v11 = vld [vmem:[%s2127_s0 + $0x10] sm:$0xff]  ;;  %vm967_vm6 = vcmask 1043459   ;;  %vm969_vm7 = vcmask 1044484   ;;  %vm971_vm8 = vcmask 1045509  }
  0x11   :  { %1329 = vmatpush3.msra.mxu0 %v40_v2  ;;  %1499 = vmatpush3.msra.mxu1 %v40_v2  ;;  %v267_v12 = vld [vmem:[#allocation2 + $0x90] sm:$0xff]  ;;  %v266_v13 = vld [vmem:[#allocation2 + $0x88] sm:$0xff]  ;;  %v1626_v14 = vld [vmem:[%s2127_s0 + $0x18] sm:$0xff]  ;;  %vm973_vm9 = vcmask 1046534   ;;  %vm975_vm10 = vcmask 1047559  }
  0x12   :  { %1330 = vmatprep.subr.mxu0 %v1555_v0  ;;  %1496 = vmatprep.subr.mxu1 %v1555_v0  ;;  %v283_v15 = vld [vmem:[#allocation2 + $0x110] sm:$0xff]  ;;  %v1635_v16 = vld [vmem:[%s2127_s0 + $0x20] sm:$0xff]  ;;  %v1642_v18 = vld [vmem:[%s2127_s0 + $0x28] sm:$0xff] }
  0x13   :  { %1331 = vmatpush3.msra.mxu0 %v39_v3  ;;  %1500 = vmatpush3.msra.mxu1 %v39_v3  ;;  %v265_v17 = vld [vmem:[#allocation2 + $0x80] sm:$0xff]  ;;  %v282_v19 = vld [vmem:[#allocation2 + $0x108] sm:$0xff]  ;;  %v1651_v20 = vld [vmem:[%s2127_s0 + $0x30] sm:$0xff] }
  0x14   :  { %1332 = vmatprep.subr.mxu0 %v1555_v0  ;;  %1497 = vmatprep.subr.mxu1 %v1555_v0  ;;  %v264_v21 = vld [vmem:[#allocation2 + $0x78] sm:$0xff]  ;;  %v281_v23 = vld [vmem:[#allocation2 + $0x100] sm:$0xff]  ;;  %v263_v24 = vld [vmem:[#allocation2 + $0x70] sm:$0xff] }
  0x15   :  { %1333 = vmatpush3.msra.mxu0 %v38_v4  ;;  %1501 = vmatpush3.msra.mxu1 %v38_v4  ;;  %v1658_v22 = vld [vmem:[%s2127_s0 + $0x38] sm:$0xff]  ;;  %v262_v26 = vld [vmem:[#allocation2 + $0x68] sm:$0xff]  ;;  %v279_v27 = vld [vmem:[#allocation2 + $0xf0] sm:$0xff] }
  0x16   :  { %1334 = vmatprep.subr.mxu0 %v1555_v0  ;;  %1498 = vmatprep.subr.mxu1 %v1555_v0  ;;  %v280_v25 = vld [vmem:[#allocation2 + $0xf8] sm:$0xff]  ;;  %v261_v28 = vld [vmem:[#allocation2 + $0x60] sm:$0xff]  ;;  %v278_v30 = vld [vmem:[#allocation2 + $0xe8] sm:$0xff] }
  0x17   :  { %1335 = vmatpush3.msra.mxu0 %v37_v5  ;;  %1502 = vmatpush3.msra.mxu1 %v37_v5  ;;  %v260_v29 = vld [vmem:[#allocation2 + $0x58] sm:$0xff]  ;;  %v259_v31 = vld [vmem:[#allocation2 + $0x50] sm:$0xff]  ;;  %v277_v32 = vld [vmem:[#allocation2 + $0xe0] sm:$0xff] }
  0x18   :  { %1337 = vmatmul.mubr.msk.f32.vlgmr.msra.gmra.mxu0 %vm41_vm1, %v1595_v6  ;;  %1361 = vmatmul.mubr.msk.f32.vlgmr.msra.gmra.mxu1 %vm41_vm1, %v36_v7  ;;  %v258_v33 = vld [vmem:[#allocation2 + $0x48] sm:$0xff]  ;;  %v276_v34 = vld [vmem:[#allocation2 + $0xd8] sm:$0xff]  ;;  %v257_v35 = vld [vmem:[#allocation2 + $0x40] sm:$0xff] }
  0x19   :  { %1339 = vmatprep.mubr.msk.f32.mxu0 %vm1556_vm0, %v1555_v0  ;;  %209 = vperm.xlu0 %1510, %v1595_v6   ;;  %v275_v36 = vld [vmem:[#allocation2 + $0xd0] sm:$0xff]  ;;  %v256_v37 = vld [vmem:[#allocation2 + $0x38] sm:$0xff]  ;;  %v274_v38 = vld [vmem:[#allocation2 + $0xc8] sm:$0xff] }
  0x1a   :  { %217 = vperm.xlu1 %1511, %v1615_v11   ;;  %1407 = vmatprep.subr.mxu0 %v268_v8  ;;  %v255_v39 = vld [vmem:[#allocation2 + $0x30] sm:$0xff]  ;;  %v273_v40 = vld [vmem:[#allocation2 + $0xc0] sm:$0xff]  ;;  %v254_v41 = vld [vmem:[#allocation2 + $0x28] sm:$0xff] }
  0x1b   :  { %1408 = vmatpush3.msra.mxu0 %v268_v8  ;;  %1363 = vmatprep.subr.mxu1 %v284_v9  ;;  %v272_v42 = vld [vmem:[#allocation2 + $0xb8] sm:$0xff]  ;;  %v253_v43 = vld [vmem:[#allocation2 + $0x20] sm:$0xff]  ;;  %v271_v44 = vld [vmem:[#allocation2 + $0xb0] sm:$0xff] }
  0x1c   :  { %1340 = vmatmul.mubr.msk.f32.gmra.mxu0 %vm41_vm1, %v1610_v10  ;;  %1409 = vmatprep.subr.mxu0 %v267_v12  ;;  %v270_v45 = vld [vmem:[#allocation2 + $0xa8] sm:$0xff]  ;;  %v269_v46 = vld [vmem:[#allocation2 + $0xa0] sm:$0xff]  ;;  %v1676_v47 = vld [vmem:[#allocation2 + $0x198] sm:$0xff] }
  0x1d   :  { %1342 = vmatprep.mubr.msk.f32.mxu0 %vm1556_vm0, %v1555_v0  ;;  %213 = vperm.xlu0 %1510, %v1610_v10   ;;  %v1690_v50 = vld [vmem:[%s2129_s2] ss:$0 sm:$0xff]  ;;  %v1697_v53 = vld [vmem:[%s2129_s2 + $0x1] ss:$0 sm:$0xff] }
  0x1e   :  { %221 = vperm.xlu1 %1511, %v1626_v14   ;;  %1410 = vmatpush3.msra.mxu0 %v267_v12 }
  0x1f   :  { %1411 = vmatprep.subr.mxu0 %v266_v13  ;;  %1364 = vmatpush3.msra.mxu1 %v284_v9 }
  0x20   :  { %1343 = vmatmul.mubr.msk.f32.gmra.mxu0 %vm41_vm1, %v1615_v11  ;;  %1365 = vmatprep.subr.mxu1 %v283_v15 }
  0x21   :  { %1345 = vmatprep.mubr.msk.f32.mxu0 %vm1556_vm0, %v1555_v0  ;;  %225 = vperm.xlu0 %1510, %v1635_v16  }
  0x22   :  { %229 = vperm.xlu1 %1511, %v1642_v18   ;;  %1412 = vmatpush3.msra.mxu0 %v266_v13 }
  0x23   :  { %1413 = vmatprep.subr.mxu0 %v265_v17  ;;  %1366 = vmatpush3.msra.mxu1 %v283_v15 }
  0x24   :  { %1346 = vmatmul.mubr.msk.f32.gmra.mxu0 %vm41_vm1, %v1626_v14  ;;  %1367 = vmatprep.subr.mxu1 %v282_v19 }
  0x25   :  { %1348 = vmatprep.mubr.msk.f32.mxu0 %vm1556_vm0, %v1555_v0  ;;  %233 = vperm.xlu0 %1510, %v1651_v20  }
  0x26   :  { %237 = vperm.xlu1 %1511, %v1658_v22   ;;  %1414 = vmatpush3.msra.mxu0 %v265_v17 }
  0x27   :  { %1415 = vmatprep.subr.mxu0 %v264_v21  ;;  %1368 = vmatpush3.msra.mxu1 %v282_v19 }
  0x28   :  { %1349 = vmatmul.mubr.msk.f32.gmra.mxu0 %vm41_vm1, %v1635_v16  ;;  %1369 = vmatprep.subr.mxu1 %v281_v23 }
  0x29   :  { %1351 = vmatprep.mubr.msk.f32.mxu0 %vm1556_vm0, %v1555_v0  ;;  %241 = vperm.xlu0 %1510, %v36_v7  }
  0x2a   :  { %1416 = vmatpush3.msra.mxu0 %v264_v21  ;;  %1370 = vmatpush3.msra.mxu1 %v281_v23 }
  0x2b   :  { %1417 = vmatprep.subr.mxu0 %v263_v24  ;;  %1371 = vmatprep.subr.mxu1 %v280_v25 }
  0x2c   :  { %1352 = vmatmul.mubr.msk.f32.gmra.mxu0 %vm41_vm1, %v1642_v18  ;;  %1372 = vmatpush3.msra.mxu1 %v280_v25 }
  0x2d   :  { %1354 = vmatprep.mubr.msk.f32.mxu0 %vm1556_vm0, %v1555_v0  ;;  %1418 = vmatpush3.msra.mxu0 %v263_v24 }
  0x2e   :  { %1419 = vmatprep.subr.mxu0 %v262_v26  ;;  %1373 = vmatprep.subr.mxu1 %v279_v27 }
  0x2f   :  { %1420 = vmatpush3.msra.mxu0 %v262_v26  ;;  %1374 = vmatpush3.msra.mxu1 %v279_v27 }
  0x30   :  { %1355 = vmatmul.mubr.msk.f32.gmra.mxu0 %vm41_vm1, %v1651_v20  ;;  %1421 = vmatprep.subr.mxu0 %v261_v28 }
  0x31   :  { %1357 = vmatprep.mubr.msk.f32.mxu0 %vm1556_vm0, %v1555_v0  ;;  %1422 = vmatpush3.msra.mxu0 %v261_v28  ;;  %v299_v28 = vld [vmem:[#allocation2 + $0x190] sm:$0xff] }
  0x32   :  { %1423 = vmatprep.subr.mxu0 %v260_v29  ;;  %1375 = vmatprep.subr.mxu1 %v278_v30 }
  0x33   :  { %1424 = vmatpush3.msra.mxu0 %v260_v29  ;;  %1376 = vmatpush3.msra.mxu1 %v278_v30 }
  0x34   :  { %1358 = vmatmul.mubr.msk.f32.gmra.mxu0 %vm41_vm1, %v1658_v22  ;;  %1425 = vmatprep.subr.mxu0 %v259_v31 }
  0x35   :  { %1426 = vmatpush3.msra.mxu0 %v259_v31  ;;  %1377 = vmatprep.subr.mxu1 %v277_v32 }
  0x36   :  { %1427 = vmatprep.subr.mxu0 %v258_v33  ;;  %1378 = vmatpush3.msra.mxu1 %v277_v32 }
  0x37   :  { %1428 = vmatpush3.msra.mxu0 %v258_v33  ;;  %1379 = vmatprep.subr.mxu1 %v276_v34  ;;  %v298_v33 = vld [vmem:[#allocation2 + $0x188] sm:$0xff] }
  0x38   :  { %1429 = vmatprep.subr.mxu0 %v257_v35  ;;  %1380 = vmatpush3.msra.mxu1 %v276_v34 }
  0x39   :  { %1430 = vmatpush3.msra.mxu0 %v257_v35  ;;  %1381 = vmatprep.subr.mxu1 %v275_v36 }
  0x3a   :  { %1431 = vmatprep.subr.mxu0 %v256_v37  ;;  %1382 = vmatpush3.msra.mxu1 %v275_v36 }
  0x3b   :  { %1432 = vmatpush3.msra.mxu0 %v256_v37  ;;  %1383 = vmatprep.subr.mxu1 %v274_v38 }
  0x3c   :  { %1433 = vmatprep.subr.mxu0 %v255_v39  ;;  %1384 = vmatpush3.msra.mxu1 %v274_v38 }
  0x3d   :  { %1434 = vmatpush3.msra.mxu0 %v255_v39  ;;  %1385 = vmatprep.subr.mxu1 %v273_v40  ;;  %v297_v39 = vld [vmem:[#allocation2 + $0x180] sm:$0xff] }
  0x3e   :  { %1435 = vmatprep.subr.mxu0 %v254_v41  ;;  %1386 = vmatpush3.msra.mxu1 %v273_v40 }
  0x3f   :  { %1436 = vmatpush3.msra.mxu0 %v254_v41  ;;  %1387 = vmatprep.subr.mxu1 %v272_v42 }
  0x40   :  { %1437 = vmatprep.subr.mxu0 %v253_v43  ;;  %1388 = vmatpush3.msra.mxu1 %v272_v42 }
  0x41   :  { %1438 = vmatpush3.msra.mxu0 %v253_v43  ;;  %1389 = vmatprep.subr.mxu1 %v271_v44 }
  0x42   :  { %1390 = vmatpush3.msra.mxu1 %v271_v44  ;;  %1512 = vset.pattern.permute.xlu1 %v1558_v48 }
  0x43   :  { %1391 = vmatprep.subr.mxu1 %v270_v45  ;;  %1513 = vset.pattern.permute.xlu0 %v1558_v48 }
  0x44   :  { %1392 = vmatpush3.msra.mxu1 %v270_v45  ;;  %730 = vperm.xlu1 %1512, %v1595_v6   ;;  %v296_v45 = vld [vmem:[#allocation2 + $0x178] sm:$0xff] }
  0x45   :  { %1393 = vmatprep.subr.mxu1 %v269_v46  ;;  %735 = vperm.xlu0 %1513, %v1610_v10  }
  0x46   :  { %1394 = vmatpush3.msra.mxu1 %v269_v46 }
  0x47   :  { %1451 = vmatprep.subr.mxu1 %v1676_v47 }
  0x48   :  { %740 = vperm.xlu1 %1512, %v1615_v11  }
  0x49   :  { %750 = vperm.xlu0 %1513, %v1635_v16  }
  0x4c   :  { %745 = vperm.xlu1 %1512, %v1626_v14  }
  0x4d   :  { %760 = vperm.xlu0 %1513, %v1651_v20  }
  0x50   :  { %755 = vperm.xlu1 %1512, %v1642_v18  }
  0x54   :  { %765 = vperm.xlu1 %1512, %v1658_v22  }
  0x94   :  { %v210_v57 = vpop.permute.xlu0 %209 }
  0x95   :  { %v218_v6 = vpop.permute.xlu1 %217 }
  0x98   :  { %v214_v4 = vpop.permute.xlu0 %213 }
  0x99   :  { %v222_v19 = vpop.permute.xlu1 %221 }
  0x9c   :  { %v226_v23 = vpop.permute.xlu0 %225 }
  0xa0   :  { %v234_v40 = vpop.permute.xlu0 %233 }
  0xd8   :  { %v135_v49 = vpop.f32.mrf.mxu0  ;;  %v1692_v51 = vpop.f32.mrf.mxu1 }
  0xd9   :  { %v181_v52 = vmax.f32 %v135_v49, 0.0  ;;  %v189_v30 = vmax.f32 %v1692_v51, 0.0 }
  0xda   :  { %v1338_v54 = vpop.f32.mrf.mxu0  ;;  %v1362_v55 = vpop.f32.mrf.mxu1 }
  0xdb   :  { %v190_v56 = vmul.f32 %v181_v52, %v1690_v50  ;;  %v198_v42 = vmul.f32 %v189_v30, %v1690_v50  ;;  %v295_v54 = vld [vmem:[#allocation2 + $0x170] sm:$0xff] }
  0xdc   :  { %v140_v58 = vpop.f32.mrf.mxu0 }
  0xdd   :  { %v199_v59 = vadd.f32 %v190_v56, %v1697_v53  ;;  %v182_v60 = vmax.f32 %v140_v58, 0.0  ;;  %v207_v56 = vadd.f32 %v198_v42, %v1697_v53  ;;  %v912_v42 = vld [vmem:[%s2129_s2 + $0x2d0] sm:$0xff] }
  0xde   :  { %v1341_v61 = vpop.f32.mrf.mxu0 }
  0xdf   :  { %v191_v62 = vmul.f32 %v182_v60, %v1690_v50  ;;  %v1702_v63 = vmul.f32 %v210_v57, %v199_v59  ;;  %v294_v59 = vld [vmem:[#allocation2 + $0x168] sm:$0xff]  ;;  %v242_v61 = vpop.permute.xlu0 %241 }
  0xe0   :  { %v145_v1 = vpop.f32.mrf.mxu0 }
  0xe1   :  { %v200_v2 = vadd.f32 %v191_v62, %v1697_v53  ;;  %v183_v3 = vmax.f32 %v145_v1, 0.0  ;;  %1439 = vmatprep.mubr.f32.mxu0 %v1702_v63  ;;  %v311_v12 = vrot.slane %v1702_v63, 1 }
  0xe2   :  { %v1344_v5 = vpop.f32.mrf.mxu0 }
  0xe3   :  { %v1706_v7 = vmul.f32 %v214_v4, %v200_v2  ;;  %v192_v8 = vmul.f32 %v183_v3, %v1690_v50  ;;  %v293_v4 = vld [vmem:[#allocation2 + $0x160] sm:$0xff]  ;;  %v1749_v5 = vmul.f32 %v242_v61, %v207_v56  ;;  %v891_v61 = vld [vmem:[%s2129_s2 + $0x228] sm:$0xff] }
  0xe4   :  { %v150_v9 = vpop.f32.mrf.mxu0  ;;  %v894_v56 = vld [vmem:[%s2129_s2 + $0x240] sm:$0xff] }
  0xe5   :  { %v201_v10 = vadd.f32 %v192_v8, %v1697_v53  ;;  %v184_v11 = vmax.f32 %v150_v9, 0.0  ;;  %1440 = vmatmul.mubr.f32.vlgmr.msra.gmra.mxu0 %v1706_v7  ;;  %v312_v13 = vrot.slane %v1706_v7, 1  ;;  %v292_v8 = vld [vmem:[#allocation2 + $0x158] sm:$0xff] }
  0xe6   :  { %v1347_v14 = vpop.f32.mrf.mxu0 }
  0xe7   :  { %v193_v15 = vmul.f32 %v184_v11, %v1690_v50  ;;  %v313_v16 = vsel %vm310_vm2, %v311_v12, %v312_v13  ;;  %v1715_v17 = vmul.f32 %v218_v6, %v201_v10  ;;  %v291_v12 = vld [vmem:[#allocation2 + $0x150] sm:$0xff] }
  0xe8   :  { %v155_v18 = vpop.f32.mrf.mxu0  ;;  %1395 = vmatprep.mubr.f32.mxu1 %v313_v16 }
  0xe9   :  { %v202_v20 = vadd.f32 %v193_v15, %v1697_v53  ;;  %v185_v21 = vmax.f32 %v155_v18, 0.0  ;;  %1442 = vmatprep.mubr.f32.mxu0 %v1715_v17  ;;  %v314_v22 = vrot.slane %v1715_v17, 1  ;;  %v548_v15 = vrot.slane %v1706_v7, 2  ;;  %v287_v7 = vld [vmem:[#allocation2 + $0x130] sm:$0xff] }
  0xea   :  { %v1350_v24 = vpop.f32.mrf.mxu0 }
  0xeb   :  { %v194_v25 = vmul.f32 %v185_v21, %v1690_v50  ;;  %v315_v26 = vsel %vm310_vm2, %v312_v13, %v314_v22  ;;  %v1722_v27 = vmul.f32 %v222_v19, %v202_v20  ;;  %v326_v13 = vrot.slane %v1749_v5, 1  ;;  %v289_v19 = vld [vmem:[#allocation2 + $0x140] sm:$0xff]  ;;  %v288_v21 = vld [vmem:[#allocation2 + $0x138] sm:$0xff] }
  0xec   :  { %v160_v29 = vpop.f32.mrf.mxu0  ;;  %1396 = vmatmul.mubr.f32.vlgmr.msra.gmra.mxu1 %v315_v26  ;;  %v547_v20 = vrot.slane %v1702_v63, 2  ;;  %v550_v24 = vrot.slane %v1715_v17, 2 }
  0xed   :  { %v203_v31 = vadd.f32 %v194_v25, %v1697_v53  ;;  %v186_v32 = vmax.f32 %v160_v29, 0.0  ;;  %1452 = vmatpush3.msra.mxu1 %v1676_v47  ;;  %1443 = vmatmul.mubr.f32.gmra.mxu0 %v1722_v27  ;;  %v316_v34 = vrot.slane %v1722_v27, 1  ;;  %v230_v47 = vpop.permute.xlu1 %229  ;;  %v285_v25 = vld [vmem:[#allocation2 + $0x120] sm:$0xff]  ;;  %v552_v63 = vrot.slane %v1722_v27, 2 }
  0xee   :  { %1453 = vmatprep.subr.mxu1 %v299_v28  ;;  %v1353_v35 = vpop.f32.mrf.mxu0  ;;  %v551_v26 = vsel %vm546_vm3, %v548_v15, %v550_v24 }
  0xef   :  { %v195_v36 = vmul.f32 %v186_v32, %v1690_v50  ;;  %1454 = vmatpush3.msra.mxu1 %v299_v28  ;;  %v317_v37 = vsel %vm310_vm2, %v314_v22, %v316_v34  ;;  %v1731_v38 = vmul.f32 %v226_v23, %v203_v31  ;;  %v549_v22 = vsel %vm546_vm3, %v547_v20, %v548_v15  ;;  %v286_v23 = vld [vmem:[#allocation2 + $0x128] sm:$0xff]  ;;  %v853_v20 = vld [vmem:[%s2129_s2 + $0xf8] sm:$0xff] }
  0xf0   :  { %1455 = vmatprep.subr.mxu1 %v298_v33  ;;  %v165_v41 = vpop.f32.mrf.mxu0  ;;  %1398 = vmatprep.mubr.f32.mxu1 %v317_v37  ;;  %v553_v29 = vsel %vm546_vm3, %v550_v24, %v552_v63  ;;  %v562_v35 = vrot.slane %v1749_v5, 2  ;;  %v919_v37 = vld [vmem:[%s2129_s2 + $0x308] sm:$0xff]  ;;  %v884_v5 = vld [vmem:[%s2129_s2 + $0x1f0] sm:$0xff]  ;;  %v854_v24 = vld [vmem:[%s2129_s2 + $0x100] sm:$0xff] }
  0xf1   :  { %v204_v43 = vadd.f32 %v195_v36, %v1697_v53  ;;  %v187_v44 = vmax.f32 %v165_v41, 0.0  ;;  %1456 = vmatpush3.msra.mxu1 %v298_v33  ;;  %1445 = vmatprep.mubr.f32.mxu0 %v1731_v38  ;;  %v318_v46 = vrot.slane %v1731_v38, 1  ;;  %v238_v10 = vpop.permute.xlu1 %237  ;;  %v554_v28 = vrot.slane %v1731_v38, 2  ;;  %v918_v38 = vld [vmem:[%s2129_s2 + $0x300] sm:$0xff]  ;;  %v920_v41 = vld [vmem:[%s2129_s2 + $0x310] sm:$0xff]  ;;  %v859_v15 = vld [vmem:[%s2129_s2 + $0x128] sm:$0xff] }
  0xf2   :  { %1457 = vmatprep.subr.mxu1 %v297_v39  ;;  %v1356_v48 = vpop.f32.mrf.mxu0  ;;  %978 = vmatprep.subr.mxu0 %v919_v37  ;;  %v830_v37 = vld [vmem:[%s2129_s2 + $0x40] sm:$0xff] }
  0xf3   :  { %v196_v49 = vmul.f32 %v187_v44, %v1690_v50  ;;  %1458 = vmatpush3.msra.mxu1 %v297_v39  ;;  %v319_v51 = vsel %vm310_vm2, %v316_v34, %v318_v46  ;;  %v1739_v52 = vmul.f32 %v230_v47, %v204_v43  ;;  %v555_v17 = vsel %vm546_vm3, %v552_v63, %v554_v28  ;;  %v921_v39 = vld [vmem:[%s2129_s2 + $0x318] sm:$0xff]  ;;  %v915_v43 = vld [vmem:[%s2129_s2 + $0x2e8] sm:$0xff] }
  0xf4   :  { %1459 = vmatprep.subr.mxu1 %v296_v45  ;;  %v170_v55 = vpop.f32.mrf.mxu0  ;;  %1399 = vmatmul.mubr.f32.gmra.mxu1 %v319_v51  ;;  %v907_v44 = vld [vmem:[%s2129_s2 + $0x2a8] sm:$0xff]  ;;  %v909_v47 = vld [vmem:[%s2129_s2 + $0x2b8] sm:$0xff]  ;;  %v900_v51 = vld [vmem:[%s2129_s2 + $0x270] sm:$0xff] }
  0xf5   :  { %v205_v57 = vadd.f32 %v196_v49, %v1697_v53  ;;  %v188_v58 = vmax.f32 %v170_v55, 0.0  ;;  %1460 = vmatpush3.msra.mxu1 %v296_v45  ;;  %1446 = vmatmul.mubr.f32.gmra.mxu0 %v1739_v52  ;;  %v320_v60 = vrot.slane %v1739_v52, 1  ;;  %v556_v30 = vrot.slane %v1739_v52, 2  ;;  %v914_v45 = vld [vmem:[%s2129_s2 + $0x2e0] sm:$0xff]  ;;  %v901_v48 = vld [vmem:[%s2129_s2 + $0x278] sm:$0xff]  ;;  %v908_v49 = vld [vmem:[%s2129_s2 + $0x2b0] sm:$0xff] }
  0xf6   :  { %1461 = vmatprep.subr.mxu1 %v295_v54  ;;  %v1359_v62 = vpop.f32.mrf.mxu0  ;;  %979 = vmatpush1.msra.mxu0 %v918_v38  ;;  %v903_v52 = vld [vmem:[%s2129_s2 + $0x288] sm:$0xff]  ;;  %v902_v55 = vld [vmem:[%s2129_s2 + $0x280] sm:$0xff]  ;;  %v849_v63 = vld [vmem:[%s2129_s2 + $0xd8] sm:$0xff] }
  0xf7   :  { %v197_v1 = vmul.f32 %v188_v58, %v1690_v50  ;;  %1462 = vmatpush3.msra.mxu1 %v295_v54  ;;  %v321_v2 = vsel %vm310_vm2, %v318_v46, %v320_v60  ;;  %v1747_v3 = vmul.f32 %v234_v40, %v205_v57  ;;  %v557_v27 = vsel %vm546_vm3, %v554_v28, %v556_v30  ;;  %v913_v40 = vld [vmem:[%s2129_s2 + $0x2d8] sm:$0xff]  ;;  %v906_v46 = vld [vmem:[%s2129_s2 + $0x2a0] sm:$0xff]  ;;  %v895_v54 = vld [vmem:[%s2129_s2 + $0x248] sm:$0xff] }
  0xf8   :  { %1463 = vmatprep.subr.mxu1 %v294_v59  ;;  %1401 = vmatprep.mubr.f32.mxu1 %v321_v2  ;;  %v897_v57 = vld [vmem:[%s2129_s2 + $0x258] sm:$0xff]  ;;  %v883_v62 = vld [vmem:[%s2129_s2 + $0x1e8] sm:$0xff]  ;;  %v882_v2 = vld [vmem:[%s2129_s2 + $0x1e0] sm:$0xff] }
  0xf9   :  { %v206_v6 = vadd.f32 %v197_v1, %v1697_v53  ;;  %1464 = vmatpush3.msra.mxu1 %v294_v59  ;;  %1448 = vmatprep.mubr.f32.mxu0 %v1747_v3  ;;  %v322_v9 = vrot.slane %v1747_v3, 1  ;;  %v290_v53 = vld [vmem:[#allocation2 + $0x148] sm:$0xff]  ;;  %v558_v31 = vrot.slane %v1747_v3, 2  ;;  %v889_v58 = vld [vmem:[%s2129_s2 + $0x218] sm:$0xff]  ;;  %v896_v59 = vld [vmem:[%s2129_s2 + $0x250] sm:$0xff] }
  0xfa   :  { %1465 = vmatprep.subr.mxu1 %v293_v4  ;;  %980 = vmatprep.subr.mxu0 %v913_v40  ;;  %v890_v1 = vld [vmem:[%s2129_s2 + $0x220] sm:$0xff]  ;;  %v885_v3 = vld [vmem:[%s2129_s2 + $0x1f8] sm:$0xff]  ;;  %v848_v28 = vld [vmem:[%s2129_s2 + $0xd0] sm:$0xff] }
  0xfb   :  { %1466 = vmatpush3.msra.mxu1 %v293_v4  ;;  %v323_v50 = vsel %vm310_vm2, %v320_v60, %v322_v9  ;;  %v251_v11 = vmul.f32 %v238_v10, %v206_v6  ;;  %v559_v33 = vsel %vm546_vm3, %v556_v30, %v558_v31  ;;  %981 = vmatpush1.msra.mxu0 %v912_v42  ;;  %v888_v60 = vld [vmem:[%s2129_s2 + $0x210] sm:$0xff]  ;;  %v877_v4 = vld [vmem:[%s2129_s2 + $0x1b8] sm:$0xff]  ;;  %v878_v10 = vld [vmem:[%s2129_s2 + $0x1c0] sm:$0xff] }
  0xfc   :  { %1467 = vmatprep.subr.mxu1 %v292_v8  ;;  %1402 = vmatmul.mubr.f32.gmra.mxu1 %v323_v50  ;;  %v876_v6 = vld [vmem:[%s2129_s2 + $0x1b0] sm:$0xff]  ;;  %v870_v50 = vld [vmem:[%s2129_s2 + $0x180] sm:$0xff]  ;;  %v843_v30 = vld [vmem:[%s2129_s2 + $0xa8] sm:$0xff] }
  0xfd   :  { %1468 = vmatpush3.msra.mxu1 %v292_v8  ;;  %1449 = vmatmul.mubr.f32.gmra.mxu0 %v251_v11  ;;  %v324_v14 = vrot.slane %v251_v11, 1  ;;  %v560_v32 = vrot.slane %v251_v11, 2  ;;  %v879_v8 = vld [vmem:[%s2129_s2 + $0x1c8] sm:$0xff]  ;;  %v873_v11 = vld [vmem:[%s2129_s2 + $0x198] sm:$0xff] }
  0xfe   :  { %1469 = vmatprep.subr.mxu1 %v291_v12  ;;  %1042 = vmatprep.mubr.f32.mxu0 %v1555_v0  ;;  %v923_v38 = vld [vmem:[%s2129_s2 + $0x328] sm:$0xff] }
  0xff   :  { %1470 = vmatpush3.msra.mxu1 %v291_v12  ;;  %v325_v16 = vsel %vm310_vm2, %v322_v9, %v324_v14  ;;  %v327_v18 = vsel %vm310_vm2, %v324_v14, %v326_v13  ;;  %v561_v34 = vsel %vm546_vm3, %v558_v31, %v560_v32  ;;  %v563_v36 = vsel %vm546_vm3, %v560_v32, %v562_v35  ;;  %v871_v9 = vld [vmem:[%s2129_s2 + $0x188] sm:$0xff]  ;;  %v865_v12 = vld [vmem:[%s2129_s2 + $0x158] sm:$0xff]  ;;  %v872_v13 = vld [vmem:[%s2129_s2 + $0x190] sm:$0xff] }
 0x100   :  { %1471 = vmatprep.subr.mxu1 %v290_v53  ;;  %1404 = vmatprep.mubr.f32.mxu1 %v325_v16  ;;  %v867_v14 = vld [vmem:[%s2129_s2 + $0x168] sm:$0xff]  ;;  %v866_v16 = vld [vmem:[%s2129_s2 + $0x160] sm:$0xff]  ;;  %v837_v32 = vld [vmem:[%s2129_s2 + $0x78] sm:$0xff] }
 0x101   :  { %1472 = vmatpush3.msra.mxu1 %v290_v53  ;;  %982 = vmatprep.subr.mxu0 %v907_v44  ;;  %v864_v53 = vld [vmem:[%s2129_s2 + $0x150] sm:$0xff]  ;;  %v842_v31 = vld [vmem:[%s2129_s2 + $0xa0] sm:$0xff] }
 0x102   :  { %1405 = vmatmul.mubr.f32.gmra.mxu1 %v327_v18  ;;  %1473 = vmatprep.subr.mxu1 %v289_v19  ;;  %v858_v18 = vld [vmem:[%s2129_s2 + $0x120] sm:$0xff]  ;;  %v828_v35 = vld [vmem:[%s2129_s2 + $0x30] sm:$0xff] }
 0x103   :  { %1474 = vmatpush3.msra.mxu1 %v289_v19  ;;  %1483 = vmatprep.mubr.f32.mxu1 %v549_v22  ;;  %v861_v19 = vld [vmem:[%s2129_s2 + $0x138] sm:$0xff]  ;;  %v852_v22 = vld [vmem:[%s2129_s2 + $0xf0] sm:$0xff] }
 0x104   :  { %1475 = vmatprep.subr.mxu1 %v288_v21  ;;  %983 = vmatpush1.msra.mxu0 %v906_v46 }
 0x105   :  { %1476 = vmatpush3.msra.mxu1 %v288_v21  ;;  %984 = vmatprep.subr.mxu0 %v901_v48  ;;  %v860_v21 = vld [vmem:[%s2129_s2 + $0x130] sm:$0xff] }
 0x106   :  { %1477 = vmatprep.subr.mxu1 %v287_v7  ;;  %985 = vmatpush1.msra.mxu0 %v900_v51 }
 0x107   :  { %1478 = vmatpush3.msra.mxu1 %v287_v7  ;;  %986 = vmatprep.subr.mxu0 %v895_v54  ;;  %v855_v7 = vld [vmem:[%s2129_s2 + $0x108] sm:$0xff] }
 0x108   :  { %1479 = vmatprep.subr.mxu1 %v286_v23  ;;  %987 = vmatpush1.msra.mxu0 %v894_v56 }
 0x109   :  { %1480 = vmatpush3.msra.mxu1 %v286_v23  ;;  %988 = vmatprep.subr.mxu0 %v889_v58  ;;  %v847_v23 = vld [vmem:[%s2129_s2 + $0xc8] sm:$0xff] }
 0x10a   :  { %1481 = vmatprep.subr.mxu1 %v285_v25  ;;  %989 = vmatpush1.msra.mxu0 %v888_v60 }
 0x10b   :  { %1482 = vmatpush3.msra.mxu1 %v285_v25  ;;  %990 = vmatprep.subr.mxu0 %v883_v62  ;;  %v846_v25 = vld [vmem:[%s2129_s2 + $0xc0] sm:$0xff] }
 0x10c   :  { %1484 = vmatmul.mubr.f32.vlgmr.msra.gmra.mxu1 %v551_v26  ;;  %1049 = vmatprep.subr.mxu1 %v921_v39  ;;  %v841_v26 = vld [vmem:[%s2129_s2 + $0x98] sm:$0xff] }
 0x10d   :  { %1486 = vmatprep.mubr.f32.mxu1 %v553_v29  ;;  %1050 = vmatpush1.msra.mxu1 %v920_v41  ;;  %v840_v29 = vld [vmem:[%s2129_s2 + $0x90] sm:$0xff] }
 0x10e   :  { %1051 = vmatprep.subr.mxu1 %v915_v43  ;;  %991 = vmatpush1.msra.mxu0 %v882_v2  ;;  %v1980_v2 = vld [vmem:[%s2129_s2 + $0x3] ss:$0 sm:$0xff] }
 0x10f   :  { %1052 = vmatpush1.msra.mxu1 %v914_v45  ;;  %992 = vmatprep.subr.mxu0 %v877_v4 }
 0x110   :  { %1487 = vmatmul.mubr.f32.gmra.mxu1 %v555_v17  ;;  %1053 = vmatprep.subr.mxu1 %v909_v47  ;;  %v835_v17 = vld [vmem:[%s2129_s2 + $0x68] sm:$0xff] }
 0x111   :  { %1489 = vmatprep.mubr.f32.mxu1 %v557_v27  ;;  %1054 = vmatpush1.msra.mxu1 %v908_v49  ;;  %v834_v27 = vld [vmem:[%s2129_s2 + $0x60] sm:$0xff] }
 0x112   :  { %1055 = vmatprep.subr.mxu1 %v903_v52  ;;  %993 = vmatpush1.msra.mxu0 %v876_v6  ;;  %v731_v52 = vpop.permute.xlu1 %730 }
 0x113   :  { %1056 = vmatpush1.msra.mxu1 %v902_v55  ;;  %994 = vmatprep.subr.mxu0 %v871_v9  ;;  %v1974_v55 = vld [vmem:[%s2129_s2 + $0x2] ss:$0 sm:$0xff] }
 0x114   :  { %1490 = vmatmul.mubr.f32.gmra.mxu1 %v559_v33  ;;  %1057 = vmatprep.subr.mxu1 %v897_v57  ;;  %v829_v33 = vld [vmem:[%s2129_s2 + $0x38] sm:$0xff] }
 0x115   :  { %1492 = vmatprep.mubr.f32.mxu1 %v561_v34  ;;  %1058 = vmatpush1.msra.mxu1 %v896_v59  ;;  %v836_v34 = vld [vmem:[%s2129_s2 + $0x70] sm:$0xff] }
 0x116   :  { %1059 = vmatprep.subr.mxu1 %v891_v61  ;;  %995 = vmatpush1.msra.mxu0 %v870_v50 }
 0x117   :  { %1060 = vmatpush1.msra.mxu1 %v890_v1  ;;  %996 = vmatprep.subr.mxu0 %v865_v12 }
 0x118   :  { %1493 = vmatmul.mubr.f32.gmra.mxu1 %v563_v36  ;;  %1061 = vmatprep.subr.mxu1 %v885_v3  ;;  %v831_v36 = vld [vmem:[%s2129_s2 + $0x48] sm:$0xff] }
 0x119   :  { %1113 = vmatprep.mubr.f32.mxu1 %v1555_v0  ;;  %1062 = vmatpush1.msra.mxu1 %v884_v5  ;;  %v741_v5 = vpop.permute.xlu1 %740 }
 0x11a   :  { %1063 = vmatprep.subr.mxu1 %v879_v8  ;;  %997 = vmatpush1.msra.mxu0 %v864_v53 }
 0x11b   :  { %1064 = vmatpush1.msra.mxu1 %v878_v10  ;;  %998 = vmatprep.subr.mxu0 %v859_v15  ;;  %v1986_v10 = vld [vmem:[%s2129_s2 + $0x4] ss:$0 sm:$0xff] }
 0x11c   :  { %1065 = vmatprep.subr.mxu1 %v873_v11  ;;  %999 = vmatpush1.msra.mxu0 %v858_v18 }
 0x11d   :  { %1066 = vmatpush1.msra.mxu1 %v872_v13  ;;  %1000 = vmatprep.subr.mxu0 %v853_v20 }
 0x11e   :  { %1067 = vmatprep.subr.mxu1 %v867_v14  ;;  %1001 = vmatpush1.msra.mxu0 %v852_v22 }
 0x11f   :  { %1068 = vmatpush1.msra.mxu1 %v866_v16  ;;  %1002 = vmatprep.subr.mxu0 %v847_v23  ;;  %v736_v23 = vpop.permute.xlu0 %735 }
 0x120   :  { %1069 = vmatprep.subr.mxu1 %v861_v19  ;;  %1003 = vmatpush1.msra.mxu0 %v846_v25 }
 0x121   :  { %1070 = vmatpush1.msra.mxu1 %v860_v21  ;;  %1004 = vmatprep.subr.mxu0 %v841_v26 }
 0x122   :  { %1071 = vmatprep.subr.mxu1 %v855_v7  ;;  %1005 = vmatpush1.msra.mxu0 %v840_v29 }
 0x123   :  { %1072 = vmatpush1.msra.mxu1 %v854_v24  ;;  %1006 = vmatprep.subr.mxu0 %v835_v17 }
 0x124   :  { %1073 = vmatprep.subr.mxu1 %v849_v63  ;;  %1007 = vmatpush1.msra.mxu0 %v834_v27  ;;  %v746_v63 = vpop.permute.xlu1 %745 }
 0x125   :  { %1074 = vmatpush1.msra.mxu1 %v848_v28  ;;  %1008 = vmatprep.subr.mxu0 %v829_v33 }
 0x126   :  { %1075 = vmatprep.subr.mxu1 %v843_v30  ;;  %1009 = vmatpush1.msra.mxu0 %v828_v35 }
 0x127   :  { %1076 = vmatpush1.msra.mxu1 %v842_v31  ;;  %1120 = vmatprep.subr.mxu0 %v923_v38 }
 0x128   :  { %1077 = vmatprep.subr.mxu1 %v837_v32 }
 0x129   :  { %1078 = vmatpush1.msra.mxu1 %v836_v34 }
 0x12a   :  { %1079 = vmatprep.subr.mxu1 %v831_v36 }
 0x12b   :  { %1080 = vmatpush1.msra.mxu1 %v830_v37 }
 0x1a5   :  { %v1441_v45 = vpop.f32.mrf.mxu0 }
 0x1a7   :  { %v507_v47 = vpop.f32.mrf.mxu0 }
 0x1ac   :  { %v1397_v39 = vpop.f32.mrf.mxu1 }
 0x1ad   :  { %v1444_v48 = vpop.f32.mrf.mxu0  ;;  %v513_v51 = vadd.f32 %v1441_v45, %v1397_v39 }
 0x1ae   :  { %v402_v40 = vpop.f32.mrf.mxu1 }
 0x1af   :  { %v508_v56 = vadd.f32 %v507_v47, %v402_v40  ;;  %v517_v57 = vpop.f32.mrf.mxu0 }
 0x1b4   :  { %v1400_v41 = vpop.f32.mrf.mxu1 }
 0x1b5   :  { %v523_v60 = vadd.f32 %v1444_v48, %v1400_v41  ;;  %v1447_v61 = vpop.f32.mrf.mxu0 }
 0x1b6   :  { %v412_v42 = vpop.f32.mrf.mxu1 }
 0x1b7   :  { %v518_v4 = vadd.f32 %v517_v57, %v412_v42  ;;  %v527_v11 = vpop.f32.mrf.mxu0  ;;  %v756_v57 = vpop.permute.xlu1 %755 }
 0x1bc   :  { %v1403_v43 = vpop.f32.mrf.mxu1 }
 0x1bd   :  { %v533_v15 = vadd.f32 %v1447_v61, %v1403_v43  ;;  %v1450_v18 = vpop.f32.mrf.mxu0 }
 0x1be   :  { %v422_v44 = vpop.f32.mrf.mxu1 }
 0x1bf   :  { %v528_v7 = vadd.f32 %v527_v11, %v422_v44  ;;  %v537_v33 = vpop.f32.mrf.mxu0 }
 0x1c2   :  { %v1406_v46 = vpop.f32.mrf.mxu1 }
 0x1c3   :  { %v543_v17 = vadd.f32 %v1450_v18, %v1406_v46 }
 0x1c4   :  { %v432_v49 = vpop.f32.mrf.mxu1 }
 0x1c5   :  { %v538_v38 = vadd.f32 %v537_v33, %v432_v49 }
 0x1cc   :  { %v1485_v54 = vpop.f32.mrf.mxu1 }
 0x1cd   :  { %v678_v58 = vadd.f32 %v1485_v54, %v513_v51 }
 0x1ce   :  { %v638_v59 = vpop.f32.mrf.mxu1 }
 0x1cf   :  { %v689_v62 = vadd.f32 %v1974_v55, %v678_v58  ;;  %v677_v1 = vadd.f32 %v638_v59, %v508_v56 }
 0x1d0   :  { %v1488_v3 = vpop.f32.mrf.mxu1 }
 0x1d1   :  { %v697_v6 = vmax.f32 %v689_v62, 0.0  ;;  %v688_v8 = vadd.f32 %v1974_v55, %v677_v1  ;;  %v680_v9 = vadd.f32 %v1488_v3, %v523_v60 }
 0x1d2   :  { %v648_v50 = vpop.f32.mrf.mxu1 }
 0x1d3   :  { %v696_v12 = vmax.f32 %v688_v8, 0.0  ;;  %v691_v13 = vadd.f32 %v1974_v55, %v680_v9  ;;  %v679_v53 = vadd.f32 %v648_v50, %v518_v4  ;;  %v705_v14 = vmul.f32 %v697_v6, %v1980_v2  ;;  %v751_v6 = vpop.permute.xlu0 %750 }
 0x1d4   :  { %v1491_v16 = vpop.f32.mrf.mxu1 }
 0x1d5   :  { %v704_v19 = vmul.f32 %v696_v12, %v1980_v2  ;;  %v699_v20 = vmax.f32 %v691_v13, 0.0  ;;  %v690_v21 = vadd.f32 %v1974_v55, %v679_v53  ;;  %v713_v22 = vadd.f32 %v705_v14, %v1986_v10 }
 0x1d6   :  { %v682_v24 = vadd.f32 %v1491_v16, %v533_v15  ;;  %v658_v25 = vpop.f32.mrf.mxu1 }
 0x1d7   :  { %v712_v26 = vadd.f32 %v704_v19, %v1986_v10  ;;  %v707_v28 = vmul.f32 %v699_v20, %v1980_v2  ;;  %v698_v29 = vmax.f32 %v690_v21, 0.0  ;;  %v769_v30 = vadd.f32 %v736_v23, %v713_v22  ;;  %v766_v20 = vpop.permute.xlu1 %765 }
 0x1d8   :  { %v693_v31 = vadd.f32 %v1974_v55, %v682_v24  ;;  %v681_v27 = vadd.f32 %v658_v25, %v528_v7  ;;  %v1494_v32 = vpop.f32.mrf.mxu1 }
 0x1d9   :  { %v768_v34 = vadd.f32 %v731_v52, %v712_v26  ;;  %v715_v35 = vadd.f32 %v707_v28, %v1986_v10  ;;  %v706_v36 = vmul.f32 %v698_v29, %v1980_v2  ;;  %v782_v37 = vrot.slane %v769_v30, 4  ;;  %v761_v26 = vpop.permute.xlu0 %760 }
 0x1da   :  { %v701_v39 = vmax.f32 %v693_v31, 0.0  ;;  %v692_v40 = vadd.f32 %v1974_v55, %v681_v27  ;;  %v684_v41 = vadd.f32 %v1494_v32, %v543_v17  ;;  %v668_v42 = vpop.f32.mrf.mxu1 }
 0x1db   :  { %v776_v43 = vrot.slane %v768_v34, 4  ;;  %v771_v44 = vadd.f32 %v746_v63, %v715_v35  ;;  %v714_v45 = vadd.f32 %v706_v36, %v1986_v10  ;;  %v783_v46 = vmax.f32 %v769_v30, %v782_v37 }
 0x1dc   :  { %v709_v47 = vmul.f32 %v701_v39, %v1980_v2  ;;  %v700_v48 = vmax.f32 %v692_v40, 0.0  ;;  %v695_v51 = vadd.f32 %v1974_v55, %v684_v41  ;;  %v683_v52 = vadd.f32 %v668_v42, %v538_v38 }
 0x1dd   :  { %v777_v54 = vmax.f32 %v768_v34, %v776_v43  ;;  %v794_v56 = vrot.slane %v771_v44, 4  ;;  %v770_v49 = vadd.f32 %v741_v5, %v714_v45  ;;  %v784_v58 = vrot.slane %v783_v46, 2 }
 0x1de   :  { %v717_v59 = vadd.f32 %v709_v47, %v1986_v10  ;;  %v708_v60 = vmul.f32 %v700_v48, %v1980_v2  ;;  %v703_v61 = vmax.f32 %v695_v51, 0.0  ;;  %v694_v62 = vadd.f32 %v1974_v55, %v683_v52 }
 0x1df   :  { %v778_v1 = vrot.slane %v777_v54, 2  ;;  %v795_v3 = vmax.f32 %v771_v44, %v794_v56  ;;  %v788_v4 = vrot.slane %v770_v49, 4  ;;  %v785_v53 = vmax.f32 %v783_v46, %v784_v58 }
 0x1e0   :  { %v773_v8 = vadd.f32 %v756_v57, %v717_v59  ;;  %v716_v9 = vadd.f32 %v708_v60, %v1986_v10  ;;  %v711_v50 = vmul.f32 %v703_v61, %v1980_v2  ;;  %v702_v11 = vmax.f32 %v694_v62, 0.0  ;;  %v922_v61 = vld [vmem:[%s2129_s2 + $0x320] sm:$0xff] }
 0x1e1   :  { %v779_v12 = vmax.f32 %v777_v54, %v778_v1  ;;  %v796_v5 = vrot.slane %v795_v3, 2  ;;  %v789_v13 = vmax.f32 %v770_v49, %v788_v4  ;;  %v786_v63 = vrot.slane %v785_v53, 1  ;;  %v917_v1 = vld [vmem:[%s2129_s2 + $0x2f8] sm:$0xff]  ;;  %v911_v4 = vld [vmem:[%s2129_s2 + $0x2c8] sm:$0xff] }
 0x1e2   :  { %v806_v14 = vrot.slane %v773_v8, 4  ;;  %v772_v15 = vadd.f32 %v751_v6, %v716_v9  ;;  %v719_v16 = vadd.f32 %v711_v50, %v1986_v10  ;;  %v710_v55 = vmul.f32 %v702_v11, %v1980_v2  ;;  %v910_v6 = vld [vmem:[%s2129_s2 + $0x2c0] sm:$0xff]  ;;  %v904_v9 = vld [vmem:[%s2129_s2 + $0x290] sm:$0xff]  ;;  %v893_v11 = vld [vmem:[%s2129_s2 + $0x238] sm:$0xff] }
 0x1e3   :  { %v780_v18 = vrot.slane %v779_v12, 1  ;;  %v790_v19 = vrot.slane %v789_v13, 2  ;;  %v797_v24 = vmax.f32 %v795_v3, %v796_v5  ;;  %v787_v36 = vmax.f32 %v785_v53, %v786_v63  ;;  %v916_v3 = vld [vmem:[%s2129_s2 + $0x2f0] sm:$0xff]  ;;  %v898_v50 = vld [vmem:[%s2129_s2 + $0x260] sm:$0xff]  ;;  %v887_v5 = vld [vmem:[%s2129_s2 + $0x208] sm:$0xff] }
 0x1e4   :  { %v807_v21 = vmax.f32 %v773_v8, %v806_v14  ;;  %v800_v22 = vrot.slane %v772_v15, 4  ;;  %v775_v7 = vadd.f32 %v766_v20, %v719_v16  ;;  %v718_v23 = vadd.f32 %v710_v55, %v1986_v10  ;;  %v905_v8 = vld [vmem:[%s2129_s2 + $0x298] sm:$0xff]  ;;  %v880_v14 = vld [vmem:[%s2129_s2 + $0x1d0] sm:$0xff]  ;;  %v874_v16 = vld [vmem:[%s2129_s2 + $0x1a0] sm:$0xff] }
 0x1e5   :  { %v791_v25 = vmax.f32 %v789_v13, %v790_v19  ;;  %v781_v31 = vmax.f32 %v779_v12, %v780_v18  ;;  %v798_v34 = vrot.slane %v797_v24, 1  ;;  %v892_v12 = vld [vmem:[%s2129_s2 + $0x230] sm:$0xff]  ;;  %v886_v13 = vld [vmem:[%s2129_s2 + $0x200] sm:$0xff]  ;;  %v881_v53 = vld [vmem:[%s2129_s2 + $0x1d8] sm:$0xff] }
 0x1e6   :  { %v808_v28 = vrot.slane %v807_v21, 2  ;;  %v801_v29 = vmax.f32 %v772_v15, %v800_v22  ;;  %v818_v30 = vrot.slane %v775_v7, 4  ;;  %v774_v17 = vadd.f32 %v761_v26, %v718_v23  ;;  %v875_v15 = vld [vmem:[%s2129_s2 + $0x1a8] sm:$0xff]  ;;  %v869_v55 = vld [vmem:[%s2129_s2 + $0x178] sm:$0xff]  ;;  %v868_v18 = vld [vmem:[%s2129_s2 + $0x170] sm:$0xff] }
 0x1e7   :  { %v792_v27 = vrot.slane %v791_v25, 1  ;;  %v964_v40 = vsel %vm963_vm4, %v787_v36, %v781_v31  ;;  %v799_v44 = vmax.f32 %v797_v24, %v798_v34  ;;  %v863_v19 = vld [vmem:[%s2129_s2 + $0x148] sm:$0xff]  ;;  %v862_v20 = vld [vmem:[%s2129_s2 + $0x140] sm:$0xff]  ;;  %v856_v22 = vld [vmem:[%s2129_s2 + $0x110] sm:$0xff] }
 0x1e8   :  { %v802_v2 = vrot.slane %v801_v29, 2  ;;  %v819_v32 = vmax.f32 %v775_v7, %v818_v30  ;;  %v812_v33 = vrot.slane %v774_v17, 4  ;;  %v809_v37 = vmax.f32 %v807_v21, %v808_v28  ;;  %v857_v21 = vld [vmem:[%s2129_s2 + $0x118] sm:$0xff]  ;;  %v851_v7 = vld [vmem:[%s2129_s2 + $0xe8] sm:$0xff]  ;;  %v850_v23 = vld [vmem:[%s2129_s2 + $0xe0] sm:$0xff] }
 0x1e9   :  { %v793_v35 = vmax.f32 %v791_v25, %v792_v27  ;;  %v845_v24 = vld [vmem:[%s2129_s2 + $0xb8] sm:$0xff]  ;;  %v844_v25 = vld [vmem:[%s2129_s2 + $0xb0] sm:$0xff]  ;;  %v839_v63 = vld [vmem:[%s2129_s2 + $0x88] sm:$0xff]  ;;  %v925_v30 = vlaneseq }
 0x1ea   :  { %v803_v10 = vmax.f32 %v801_v29, %v802_v2  ;;  %v820_v38 = vrot.slane %v819_v32, 2  ;;  %v813_v39 = vmax.f32 %v774_v17, %v812_v33  ;;  %v810_v45 = vrot.slane %v809_v37, 1  ;;  %v838_v26 = vld [vmem:[%s2129_s2 + $0x80] sm:$0xff]  ;;  %v833_v28 = vld [vmem:[%s2129_s2 + $0x58] sm:$0xff]  ;;  %v832_v29 = vld [vmem:[%s2129_s2 + $0x50] sm:$0xff] }
 0x1eb   :  { %v966_v41 = vsel %vm965_vm5, %v793_v35, %v964_v40  ;;  %v926_v17 = vshrl.u32 %v925_v30, 7  ;;  %v1241_v31 = vld [vmem:[%s2129_s2 + $0x5] ss:$8 sm:$0xf] }
 0x1ec   :  { %v804_v42 = vrot.slane %v803_v10, 1  ;;  %v814_v43 = vrot.slane %v813_v39, 2  ;;  %v821_v46 = vmax.f32 %v819_v32, %v820_v38  ;;  %v968_v51 = vsel %vm967_vm6, %v799_v44, %v966_v41  ;;  %v1242_v27 = vld [vmem:[%s2129_s2 + $0x5] ss:$8 sm:$0x30] }
 0x1ed   :  { %v811_v57 = vmax.f32 %v809_v37, %v810_v45  ;;  %v827_v2 = vor.u32 %v1242_v27, %v1241_v31  ;;  %v927_v32 = vsub.s32 0, %v926_v17  ;;  %v931_v34 = vsub.s32 1, %v926_v17 }
 0x1ee   :  { %v805_v47 = vmax.f32 %v803_v10, %v804_v42  ;;  %v815_v48 = vmax.f32 %v813_v39, %v814_v43  ;;  %v822_v52 = vrot.slane %v821_v46, 1  ;;  %v935_v37 = vsub.s32 2, %v926_v17 }
 0x1ef   :  { %v928_v33 = vrot.slane %v827_v2, %v927_v32  ;;  %v932_v10 = vrot.slane %v827_v2, %v931_v34  ;;  %v939_v44 = vsub.s32 3, %v926_v17 }
 0x1f0   :  { %v970_v54 = vsel %vm969_vm7, %v805_v47, %v968_v51  ;;  %v816_v56 = vrot.slane %v815_v48, 1  ;;  %v823_v58 = vmax.f32 %v821_v46, %v822_v52  ;;  %v936_v40 = vrot.slane %v827_v2, %v935_v37 }
 0x1f1   :  { %v972_v59 = vsel %vm971_vm8, %v811_v57, %v970_v54  ;;  %v940_v46 = vrot.slane %v827_v2, %v939_v44 }
 0x1f2   :  { %v817_v49 = vmax.f32 %v815_v48, %v816_v56 }
 0x1f4   :  { %v974_v60 = vsel %vm973_vm9, %v817_v49, %v972_v59  ;;  %v947_v59 = vsub.s32 5, %v926_v17 }
 0x1f5   :  { %v2013_v62 = vsel %vm975_vm10, %v823_v58, %v974_v60  ;;  %v943_v58 = vsub.s32 4, %v926_v17 }
 0x1f6   :  { %1043 = vmatmul.mubr.f32.vlgmr.msra.gmra.mxu0 %v2013_v62  ;;  %1114 = vmatmul.mubr.f32.vlgmr.msra.gmra.mxu1 %v2013_v62 }
 0x1f7   :  { %1121 = vmatpush1.msra.mxu0 %v922_v61  ;;  %1184 = vmatprep.mubr.f32.mxu0 %v1555_v0  ;;  %v899_v0 = vld [vmem:[%s2129_s2 + $0x268] sm:$0xff]  ;;  %v944_v60 = vrot.slane %v827_v2, %v943_v58 }
 0x1f8   :  { %1122 = vmatprep.subr.mxu0 %v917_v1 }
 0x1f9   :  { %1123 = vmatpush1.msra.mxu0 %v916_v3 }
 0x1fa   :  { %1124 = vmatprep.subr.mxu0 %v911_v4 }
 0x1fb   :  { %1125 = vmatpush1.msra.mxu0 %v910_v6 }
 0x1fc   :  { %1126 = vmatprep.subr.mxu0 %v905_v8 }
 0x1fd   :  { %1127 = vmatpush1.msra.mxu0 %v904_v9 }
 0x1fe   :  { %1128 = vmatprep.subr.mxu0 %v899_v0 }
 0x1ff   :  { %1129 = vmatpush1.msra.mxu0 %v898_v50  ;;  %v1215_v50 = vld [vmem:[%s2129_s2 + $0x6] ss:$0 sm:$0xff] }
 0x200   :  { %1130 = vmatprep.subr.mxu0 %v893_v11 }
 0x201   :  { %1131 = vmatpush1.msra.mxu0 %v892_v12 }
 0x202   :  { %1132 = vmatprep.subr.mxu0 %v887_v5 }
 0x203   :  { %1133 = vmatpush1.msra.mxu0 %v886_v13 }
 0x204   :  { %1134 = vmatprep.subr.mxu0 %v881_v53 }
 0x205   :  { %1135 = vmatpush1.msra.mxu0 %v880_v14 }
 0x206   :  { %1136 = vmatprep.subr.mxu0 %v875_v15 }
 0x207   :  { %1137 = vmatpush1.msra.mxu0 %v874_v16 }
 0x208   :  { %1138 = vmatprep.subr.mxu0 %v869_v55 }
 0x209   :  { %1139 = vmatpush1.msra.mxu0 %v868_v18 }
 0x20a   :  { %1140 = vmatprep.subr.mxu0 %v863_v19 }
 0x20b   :  { %1141 = vmatpush1.msra.mxu0 %v862_v20 }
 0x20c   :  { %1142 = vmatprep.subr.mxu0 %v857_v21  ;;  %v1216_v21 = vld [vmem:[%s2129_s2 + $0xe] ss:$0 sm:$0xff] }
 0x20d   :  { %1143 = vmatpush1.msra.mxu0 %v856_v22 }
 0x20e   :  { %1144 = vmatprep.subr.mxu0 %v851_v7 }
 0x20f   :  { %1145 = vmatpush1.msra.mxu0 %v850_v23 }
 0x210   :  { %1146 = vmatprep.subr.mxu0 %v845_v24  ;;  %v1217_v24 = vld [vmem:[%s2129_s2 + $0x7] ss:$0 sm:$0xff] }
 0x211   :  { %1147 = vmatpush1.msra.mxu0 %v844_v25 }
 0x212   :  { %1148 = vmatprep.subr.mxu0 %v839_v63 }
 0x213   :  { %1149 = vmatpush1.msra.mxu0 %v838_v26 }
 0x214   :  { %1150 = vmatprep.subr.mxu0 %v833_v28 }
 0x215   :  { %1151 = vmatpush1.msra.mxu0 %v832_v29 }
 0x216   :  { %1185 = vmatmul.mubr.f32.vlgmr.msra.gmra.mxu0 %v2013_v62  ;;  %v948_v62 = vrot.slane %v827_v2, %v947_v59 }
 0x2b6   :  { %v1044_v35 = vpop.f32.mrf.mxu0  ;;  %v1115_v42 = vpop.f32.mrf.mxu1 }
 0x2b7   :  { %v1045_v36 = vadd.f32 %v1044_v35, %v928_v33  ;;  %v1116_v43 = vadd.f32 %v1115_v42, %v936_v40 }
 0x2b8   :  { %v1046_v38 = vpop.f32.mrf.mxu0  ;;  %v1117_v47 = vpop.f32.mrf.mxu1 }
 0x2b9   :  { %v1191_v39 = vmul.f32 0.5, %v1045_v36  ;;  %v1047_v41 = vadd.f32 %v1046_v38, %v932_v10  ;;  %v1196_v45 = vmul.f32 0.5, %v1116_v43  ;;  %v1118_v52 = vadd.f32 %v1117_v47, %v940_v46 }
 0x2bb   :  { %1514 = vtanh.f32 %v1191_v39  ;;  %v1203_v49 = vmul.f32 0.5, %v1118_v52 }
 0x2bc   :  { %1516 = vtanh.f32 %v1047_v41 }
 0x2bd   :  { %1518 = vtanh.f32 %v1196_v45 }
 0x2c8   :  { %v1515_v48 = vpop.eup %1514 }
 0x2c9   :  { %v1193_v51 = vadd.f32 1.0, %v1515_v48  ;;  %v1517_v56 = vpop.eup %1516 }
 0x2ca   :  { %v1519_v61 = vpop.eup %1518 }
 0x2cb   :  { %v1194_v54 = vmul.f32 0.5, %v1193_v51  ;;  %v1198_v3 = vadd.f32 1.0, %v1519_v61 }
 0x2cd   :  { %v1200_v57 = vmul.f32 %v1517_v56, %v1194_v54  ;;  %v1199_v9 = vmul.f32 0.5, %v1198_v3 }
 0x2cf   :  { %1520 = vtanh.f32 %v1200_v57 }
 0x2d0   :  { %1522 = vtanh.f32 %v1203_v49 }
 0x2d6   :  { %v1186_v1 = vpop.f32.mrf.mxu0 }
 0x2d7   :  { %v1187_v4 = vadd.f32 %v1186_v1, %v944_v60 }
 0x2d8   :  { %v1188_v6 = vpop.f32.mrf.mxu0 }
 0x2d9   :  { %1524 = vtanh.f32 %v1187_v4  ;;  %v1189_v8 = vadd.f32 %v1188_v6, %v948_v62 }
 0x2db   :  { %v1208_v11 = vmul.f32 0.5, %v1189_v8 }
 0x2dc   :  { %v1521_v0 = vpop.eup %1520 }
 0x2dd   :  { %v1202_v12 = vmul.f32 %v1521_v0, %v1199_v9  ;;  %v1523_v5 = vpop.eup %1522  ;;  %1526 = vtanh.f32 %v1208_v11 }
 0x2de   :  { %v1205_v53 = vadd.f32 1.0, %v1523_v5 }
 0x2df   :  { %v1218_v13 = vmul.f32 %v1215_v50, %v1202_v12 }
 0x2e0   :  { %v1206_v14 = vmul.f32 0.5, %v1205_v53 }
 0x2e1   :  { %1219 = vadd.xlane.f32.xlu0 %v1218_v13 }
 0x2e6   :  { %v1525_v15 = vpop.eup %1524 }
 0x2e7   :  { %v1212_v16 = vmul.f32 %v1525_v15, %v1206_v14 }
 0x2e9   :  { %1528 = vtanh.f32 %v1212_v16 }
 0x2ea   :  { %v1527_v55 = vpop.eup %1526 }
 0x2eb   :  { %v1210_v18 = vadd.f32 1.0, %v1527_v55 }
 0x2ed   :  { %v1211_v19 = vmul.f32 0.5, %v1210_v18 }
 0x2f6   :  { %v1529_v20 = vpop.eup %1528 }
 0x2f7   :  { %v1214_v22 = vmul.f32 %v1529_v20, %v1211_v19 }
 0x2f9   :  { %v1221_v7 = vmul.f32 %v1216_v21, %v1214_v22 }
 0x2fb   :  { %1222 = vadd.xlane.f32.xlu1 %v1221_v7 }
 0x36a   :  { %v1220_v23 = vpop.xlane.xlu0 %1219 }
 0x384   :  { %v1223_v25 = vpop.xlane.xlu1 %1222 }
 0x385   :  { %v1224_v63 = vadd.f32 %v1223_v25, %v1220_v23 }
 0x387   :  { %v1225_v26 = vadd.f32 %v1224_v63, %v1217_v24 }
 0x389   :  { %1226 = vst [vmem:[%s2130_s3] sm:$0xff] %v1225_v26 }
 0x38a   :  { %1231 = vsyncpa [#allocation3], 1 }

</bundles_post_ra>
